<compile_context>
chip_gen: v7x
topology: tpu7x:2x2x1
jax: 0.10.0
libtpu: 0.0.40
codegen_flags: <defaults>
</compile_context>

<pallas_src>
import functools

import jax
import jax.numpy as jnp
from jax.experimental import pallas as pl
from jax.experimental.pallas import tpu as pltpu


def _channel_attention_kernel(s_total, tile_s,
                              gamma_ref, x_ref, w1t_ref, w2t_ref, o_ref,
                              sum_sc, max_sc):
    # gamma_ref: SMEM f32[2]          (gamma1, gamma2)
    # x_ref:     VMEM (1, C, tile_s)  current spatial tile of one batch sample
    # w1t_ref:   VMEM (C, Ch)         fc1 weight, transposed
    # w2t_ref:   VMEM (Ch, C)         fc2 weight, transposed
    # o_ref:     VMEM (1, 1, C)       sigmoid(channel attention) for this sample
    # sum_sc:    VMEM (1, C)          f32 running channel sums
    # max_sc:    VMEM (1, C)          f32 running channel maxes
    k = pl.program_id(1)
    num_k = pl.num_programs(1)

    @pl.when(k == 0)
    def _init():
        sum_sc[...] = jnp.zeros_like(sum_sc)
        max_sc[...] = jnp.full_like(max_sc, -jnp.inf)

    # Stream the tile in its native dtype; widen only for the reduction.
    xf = x_ref[...].astype(jnp.float32)                              # (1, C, ts)

    has_remainder = (s_total % tile_s) != 0                          # static

    if has_remainder:
        # Steady-state tiles: mask-free per-tile XLU reduce into (1, C) accs.
        @pl.when(k < num_k - 1)
        def _full_tile():
            sum_sc[...] = sum_sc[...] + jnp.sum(xf, axis=-1)
            max_sc[...] = jnp.maximum(max_sc[...], jnp.max(xf, axis=-1))

        # Last (ragged) tile only: mask out-of-range lanes before reducing.
        @pl.when(k == num_k - 1)
        def _ragged_tile():
            lane = jax.lax.broadcasted_iota(jnp.int32, xf.shape, dimension=2)
            valid = (k * tile_s + lane) < s_total
            x_for_sum = jnp.where(valid, xf, 0.0)
            x_for_max = jnp.where(valid, xf, -jnp.inf)
            sum_sc[...] = sum_sc[...] + jnp.sum(x_for_sum, axis=-1)
            max_sc[...] = jnp.maximum(max_sc[...], jnp.max(x_for_max, axis=-1))
    else:
        sum_sc[...] = sum_sc[...] + jnp.sum(xf, axis=-1)
        max_sc[...] = jnp.maximum(max_sc[...], jnp.max(xf, axis=-1))

    @pl.when(k == num_k - 1)
    def _finalize():
        avg = sum_sc[...] * (1.0 / float(s_total))                    # (1, C)
        mx = max_sc[...]                                              # (1, C)

        w1t = w1t_ref[...].astype(jnp.float32)                        # (C, Ch)
        w2t = w2t_ref[...].astype(jnp.float32)                        # (Ch, C)

        # Fused shared MLP: one fc1 matmul on stacked (avg, max), gammas after
        # the ReLU, one fc2 matmul.  Valid only because fc2 has no bias:
        # fc2(g1*h1 + g2*h2) == g1*fc2(h1) + g2*fc2(h2).
        p = jnp.concatenate([avg, mx], axis=0)                        # (2, C)
        h = jnp.maximum(
            jnp.dot(p, w1t, preferred_element_type=jnp.float32), 0.0)  # (2, Ch)
        g1 = gamma_ref[0]
        g2 = gamma_ref[1]
        hs = g1 * h[0:1, :] + g2 * h[1:2, :]                          # (1, Ch)
        out = jnp.dot(hs, w2t, preferred_element_type=jnp.float32)    # (1, C)
        out = 1.0 / (1.0 + jnp.exp(-out))                             # sigmoid
        o_ref[...] = out.reshape(o_ref.shape).astype(o_ref.dtype)


def _pick_tile(S, C, itemsize, tile_s):
    """Pick the spatial tile: ~2 MiB x-blocks, lane-aligned, >=2 KiB per-channel
    contiguous DMA runs (multiple of 512 for f32 / 1024 for bf16)."""
    if tile_s is not None:
        ts = int(tile_s)
        assert ts % 128 == 0, "explicit tile_s must be lane-aligned"
    else:
        align = 512 if itemsize >= 4 else 1024
        target_bytes = 2 * 1024 * 1024
        ts = max((target_bytes // (C * itemsize)) // align * align, align)
    # Full extent is always a legal block shape if S fits in one tile.
    return S if S <= ts else ts


def channel_attention(x, w1, w2, gamma1, gamma2, *, tile_s=None):
    """x: (N, C, D, H, W); w1: (C//r, C, 1, 1, 1); w2: (C, C//r, 1, 1, 1)."""
    N, C, D, H, W = x.shape
    Ch = w1.shape[0]
    S = D * H * W

    x3 = x.reshape(N, C, S)
    w1_t = w1.reshape(Ch, C).T.astype(jnp.float32)     # (C, Ch)
    w2_t = w2.reshape(C, Ch).T.astype(jnp.float32)     # (Ch, C)
    gammas = jnp.concatenate(
        [jnp.asarray(gamma1, jnp.float32).reshape(1),
         jnp.asarray(gamma2, jnp.float32).reshape(1)])

    itemsize = jnp.dtype(x.dtype).itemsize
    ts = _pick_tile(S, C, itemsize, tile_s)
    num_k = pl.cdiv(S, ts)

    # VMEM budget: double-buffered x blocks + weights + tiny accumulators.
    block_bytes = C * ts * itemsize
    vmem_limit = int(min(max(4 * block_bytes + (4 << 20), 16 << 20), 64 << 20))

    cost = pl.CostEstimate(
        flops=int(2 * N * C * S + 2 * (2 * N) * C * Ch + 2 * N * Ch * C),
        transcendentals=int(N * C),
        bytes_accessed=int(x3.size * itemsize
                           + (w1_t.size + w2_t.size) * 4 + N * C * 4),
    )

    out = pl.pallas_call(
        functools.partial(_channel_attention_kernel, S, ts),
        out_shape=jax.ShapeDtypeStruct((N, 1, C), jnp.float32),
        grid_spec=pltpu.PrefetchScalarGridSpec(
            num_scalar_prefetch=0,
            grid=(N, num_k),
            in_specs=[
                pl.BlockSpec(memory_space=pltpu.MemorySpace.SMEM),    # gammas
                pl.BlockSpec((1, C, ts), lambda i, k: (i, 0, k)),     # x tile
                pl.BlockSpec((C, Ch), lambda i, k: (0, 0)),           # w1^T
                pl.BlockSpec((Ch, C), lambda i, k: (0, 0)),           # w2^T
            ],
            out_specs=pl.BlockSpec((1, 1, C), lambda i, k: (i, 0, 0)),
            scratch_shapes=[
                pltpu.VMEM((1, C), jnp.float32),   # running channel sum
                pltpu.VMEM((1, C), jnp.float32),   # running channel max
            ],
        ),
        compiler_params=pltpu.CompilerParams(
            dimension_semantics=("parallel", "arbitrary"),
            vmem_limit_bytes=vmem_limit,
        ),
        cost_estimate=cost,
    )(gammas, x3, w1_t, w2_t)

    return out.reshape(N, C, 1, 1, 1).astype(x.dtype)


def channel_attention_ref(x, w1, w2, gamma1, gamma2):
    """Pure-JAX reference mirroring the PyTorch forward."""
    N, C, D, H, W = x.shape
    Ch = w1.shape[0]
    xf = x.reshape(N, C, -1).astype(jnp.float32)
    avg = jnp.mean(xf, axis=-1)
    mx = jnp.max(xf, axis=-1)
    w1m = w1.reshape(Ch, C).astype(jnp.float32)
    w2m = w2.reshape(C, Ch).astype(jnp.float32)

    def mlp(p):
        h = jnp.maximum(p @ w1m.T, 0.0)
        return h @ w2m.T

    out = gamma1 * mlp(avg) + gamma2 * mlp(mx)
    return jax.nn.sigmoid(out).reshape(N, C, 1, 1, 1).astype(x.dtype)


if __name__ == "__main__":
    ch_in, ratio = 32, 8
    ch_hidden = ch_in // ratio

    key = jax.random.PRNGKey(0)
    kx, kw1, kw2, kx2 = jax.random.split(key, 4)

    # Conv3d 1x1x1 weights (bias=False), deterministic synthetic init.
    w1 = jax.random.normal(kw1, (ch_hidden, ch_in, 1, 1, 1), dtype=jnp.float32) * 0.1
    w2 = jax.random.normal(kw2, (ch_in, ch_hidden, 1, 1, 1), dtype=jnp.float32) * 0.1
    # PyTorch __init__ uses gamma = 0 (output would be uniformly 0.5); use small
    # nonzero values so the MLP path is actually exercised.
    gamma1 = jnp.float32(0.7)
    gamma2 = jnp.float32(-0.3)

    # Case 1: auto-sized tile (small S -> single full-extent tile).
    N, D, H, W = 2, 8, 16, 16
    x = jax.random.normal(kx, (N, ch_in, D, H, W), dtype=jnp.float32)
    out = jax.block_until_ready(channel_attention(x, w1, w2, gamma1, gamma2))
    ref = channel_attention_ref(x, w1, w2, gamma1, gamma2)
    assert out.shape == (N, ch_in, 1, 1, 1), out.shape
    assert jnp.allclose(out, ref, atol=1e-5, rtol=1e-5), \
        f"max abs err {jnp.max(jnp.abs(out - ref))}"

    # Case 2: forced small tile -> multi-tile streaming path (S % ts == 0).
    out_b = jax.block_until_ready(
        channel_attention(x, w1, w2, gamma1, gamma2, tile_s=512))
    assert jnp.allclose(out_b, ref, atol=1e-5, rtol=1e-5), \
        f"max abs err {jnp.max(jnp.abs(out_b - ref))}"

    # Case 3: ragged spatial size with forced small tile -> remainder masking
    # on the last tile only.
    N2, D2, H2, W2 = 2, 5, 16, 17
    x2 = jax.random.normal(kx2, (N2, ch_in, D2, H2, W2), dtype=jnp.float32)
    out2 = jax.block_until_ready(
        channel_attention(x2, w1, w2, gamma1, gamma2, tile_s=512))
    ref2 = channel_attention_ref(x2, w1, w2, gamma1, gamma2)
    assert jnp.allclose(out2, ref2, atol=1e-5, rtol=1e-5), \
        f"max abs err {jnp.max(jnp.abs(out2 - ref2))}"

    print("KERNEL_OK")
</pallas_src>

<mosaic_0001>
module attributes {stable_mosaic.version = 11 : i64} {
  func.func @_channel_attention_kernel(%arg0: i32, %arg1: i32, %arg2: memref<2xf32, #tpu.memory_space<smem>>, %arg3: memref<1x32x2048xf32, #tpu.memory_space<vmem>>, %arg4: memref<32x4xf32, #tpu.memory_space<vmem>>, %arg5: memref<4x32xf32, #tpu.memory_space<vmem>>, %arg6: memref<1x1x32xf32, #tpu.memory_space<vmem>>, %arg7: memref<1x32xf32, #tpu.memory_space<vmem>>, %arg8: memref<1x32xf32, #tpu.memory_space<vmem>>) attributes {dimension_semantics = [#tpu.dimension_semantics<parallel>, #tpu.dimension_semantics<arbitrary>], iteration_bounds = array<i64: 2, 1>, scalar_prefetch = 0 : i64, scratch_operands = 2 : i64, tpu.core_type = #tpu.core_type<tc>, window_params = [{transform_indices = @transform_0, window_bounds = array<i64: 2>}, {transform_indices = @transform_1, window_bounds = array<i64: 1, 32, 2048>}, {pipeline_mode = #tpu.pipeline_mode<synchronous>, transform_indices = @transform_2, window_bounds = array<i64: 32, 4>}, {pipeline_mode = #tpu.pipeline_mode<synchronous>, transform_indices = @transform_3, window_bounds = array<i64: 4, 32>}, {transform_indices = @transform_4, window_bounds = array<i64: 1, 1, 32>}]} {
    %c0_i32 = arith.constant 0 : i32
    %0 = arith.cmpi eq, %arg1, %c0_i32 : i32
    %1 = arith.extui %0 : i1 to i32
    %c0_i32_0 = arith.constant 0 : i32
    %2 = arith.cmpi ne, %1, %c0_i32_0 : i32
    scf.if %2 {
      %cst_14 = arith.constant 0.000000e+00 : f32
      %15 = vector.broadcast %cst_14 : f32 to vector<1x32xf32>
      %c0_15 = arith.constant 0 : index
      %c0_16 = arith.constant 0 : index
      %16 = vector.load %arg7[%c0_15, %c0_16] : memref<1x32xf32, #tpu.memory_space<vmem>>, vector<1x32xf32>
      tpu.vector_store %arg7[%c0_15, %c0_16], %15 {strides = array<i32>} : memref<1x32xf32, #tpu.memory_space<vmem>>, vector<1x32xf32>,
      %cst_17 = arith.constant 0xFF800000 : f32
      %17 = vector.broadcast %cst_17 : f32 to vector<1x32xf32>
      %c0_18 = arith.constant 0 : index
      %c0_19 = arith.constant 0 : index
      %18 = vector.load %arg8[%c0_18, %c0_19] : memref<1x32xf32, #tpu.memory_space<vmem>>, vector<1x32xf32>
      tpu.vector_store %arg8[%c0_18, %c0_19], %17 {strides = array<i32>} : memref<1x32xf32, #tpu.memory_space<vmem>>, vector<1x32xf32>,
    } else {
    }
    %c0 = arith.constant 0 : index
    %c0_1 = arith.constant 0 : index
    %c0_2 = arith.constant 0 : index
    %3 = vector.load %arg3[%c0, %c0_1, %c0_2] : memref<1x32x2048xf32, #tpu.memory_space<vmem>>, vector<1x32x2048xf32>
    %c0_3 = arith.constant 0 : index
    %c0_4 = arith.constant 0 : index
    %4 = vector.load %arg7[%c0_3, %c0_4] : memref<1x32xf32, #tpu.memory_space<vmem>>, vector<1x32xf32>
    %cst = arith.constant dense<0.000000e+00> : vector<1x32xf32>
    %5 = vector.multi_reduction <add>, %3, %cst [2] : vector<1x32x2048xf32> to vector<1x32xf32>
    %6 = arith.addf %4, %5 : vector<1x32xf32>
    %c0_5 = arith.constant 0 : index
    %c0_6 = arith.constant 0 : index
    %7 = vector.load %arg7[%c0_5, %c0_6] : memref<1x32xf32, #tpu.memory_space<vmem>>, vector<1x32xf32>
    tpu.vector_store %arg7[%c0_5, %c0_6], %6 {strides = array<i32>} : memref<1x32xf32, #tpu.memory_space<vmem>>, vector<1x32xf32>,
    %c0_7 = arith.constant 0 : index
    %c0_8 = arith.constant 0 : index
    %8 = vector.load %arg8[%c0_7, %c0_8] : memref<1x32xf32, #tpu.memory_space<vmem>>, vector<1x32xf32>
    %cst_9 = arith.constant dense<0xFF800000> : vector<1x32xf32>
    %9 = vector.multi_reduction <maximumf>, %3, %cst_9 [2] : vector<1x32x2048xf32> to vector<1x32xf32>
    %10 = arith.maximumf %8, %9 : vector<1x32xf32>
    %c0_10 = arith.constant 0 : index
    %c0_11 = arith.constant 0 : index
    %11 = vector.load %arg8[%c0_10, %c0_11] : memref<1x32xf32, #tpu.memory_space<vmem>>, vector<1x32xf32>
    tpu.vector_store %arg8[%c0_10, %c0_11], %10 {strides = array<i32>} : memref<1x32xf32, #tpu.memory_space<vmem>>, vector<1x32xf32>,
    %c0_i32_12 = arith.constant 0 : i32
    %12 = arith.cmpi eq, %arg1, %c0_i32_12 : i32
    %13 = arith.extui %12 : i1 to i32
    %c0_i32_13 = arith.constant 0 : i32
    %14 = arith.cmpi ne, %13, %c0_i32_13 : i32
    scf.if %14 {
      %c0_14 = arith.constant 0 : index
      %c0_15 = arith.constant 0 : index
      %15 = vector.load %arg7[%c0_14, %c0_15] : memref<1x32xf32, #tpu.memory_space<vmem>>, vector<1x32xf32>
      %cst_16 = arith.constant 4.8828125E-4 : f32
      %16 = vector.broadcast %cst_16 : f32 to vector<1x32xf32>
      %17 = arith.mulf %15, %16 : vector<1x32xf32>
      %c0_17 = arith.constant 0 : index
      %c0_18 = arith.constant 0 : index
      %18 = vector.load %arg8[%c0_17, %c0_18] : memref<1x32xf32, #tpu.memory_space<vmem>>, vector<1x32xf32>
      %c0_19 = arith.constant 0 : index
      %c0_20 = arith.constant 0 : index
      %19 = vector.load %arg4[%c0_19, %c0_20] : memref<32x4xf32, #tpu.memory_space<vmem>>, vector<32x4xf32>
      %c0_21 = arith.constant 0 : index
      %c0_22 = arith.constant 0 : index
      %20 = vector.load %arg5[%c0_21, %c0_22] : memref<4x32xf32, #tpu.memory_space<vmem>>, vector<4x32xf32>
      %21 = tpu.concatenate %17, %18 in 0 : vector<1x32xf32>, vector<1x32xf32> -> vector<2x32xf32>
      %cst_23 = arith.constant dense<0.000000e+00> : vector<2x4xf32>
      %22 = tpu.matmul %21, %19, %cst_23 {dimension_numbers = #tpu.dot_dimension_numbers<[1], [0], [0], [1], [0, 0, 1, 1], [], []>} : vector<2x32xf32>, vector<32x4xf32>, vector<2x4xf32> -> vector<2x4xf32>
      %cst_24 = arith.constant 0.000000e+00 : f32
      %23 = vector.broadcast %cst_24 : f32 to vector<2x4xf32>
      %24 = arith.maximumf %22, %23 : vector<2x4xf32>
      %c0_25 = arith.constant 0 : index
      %25 = memref.load %arg2[%c0_25] : memref<2xf32, #tpu.memory_space<smem>>
      %c1 = arith.constant 1 : index
      %26 = memref.load %arg2[%c1] : memref<2xf32, #tpu.memory_space<smem>>
      %27 = vector.extract_strided_slice %24 {offsets = [0, 0], sizes = [1, 4], strides = [1, 1]} : vector<2x4xf32> to vector<1x4xf32>
      %28 = vector.broadcast %25 : f32 to vector<1x4xf32>
      %29 = arith.mulf %28, %27 : vector<1x4xf32>
      %30 = vector.extract_strided_slice %24 {offsets = [1, 0], sizes = [1, 4], strides = [1, 1]} : vector<2x4xf32> to vector<1x4xf32>
      %31 = vector.broadcast %26 : f32 to vector<1x4xf32>
      %32 = arith.mulf %31, %30 : vector<1x4xf32>
      %33 = arith.addf %29, %32 : vector<1x4xf32>
      %cst_26 = arith.constant dense<0.000000e+00> : vector<1x32xf32>
      %34 = tpu.matmul %33, %20, %cst_26 {dimension_numbers = #tpu.dot_dimension_numbers<[1], [0], [0], [1], [0, 0, 1, 1], [], []>} : vector<1x4xf32>, vector<4x32xf32>, vector<1x32xf32> -> vector<1x32xf32>
      %cst_27 = arith.constant 0.000000e+00 : f32
      %35 = vector.broadcast %cst_27 : f32 to vector<1x32xf32>
      %36 = arith.subf %35, %34 : vector<1x32xf32>
      %37 = math.exp %36 : vector<1x32xf32>
      %cst_28 = arith.constant 1.000000e+00 : f32
      %38 = vector.broadcast %cst_28 : f32 to vector<1x32xf32>
      %39 = arith.addf %38, %37 : vector<1x32xf32>
      %cst_29 = arith.constant 1.000000e+00 : f32
      %40 = vector.broadcast %cst_29 : f32 to vector<1x32xf32>
      %41 = arith.divf %40, %39 : vector<1x32xf32>
      %42 = vector.shape_cast %41 : vector<1x32xf32> to vector<1x1x32xf32>
      %c0_30 = arith.constant 0 : index
      %c0_31 = arith.constant 0 : index
      %c0_32 = arith.constant 0 : index
      %43 = vector.load %arg6[%c0_30, %c0_31, %c0_32] : memref<1x1x32xf32, #tpu.memory_space<vmem>>, vector<1x1x32xf32>
      tpu.vector_store %arg6[%c0_30, %c0_31, %c0_32], %42 {strides = array<i32>} : memref<1x1x32xf32, #tpu.memory_space<vmem>>, vector<1x1x32xf32>,
    } else {
    }
    return
  }
  func.func @transform_0(%arg0: i32, %arg1: i32) -> i32 {
    %c0_i32 = arith.constant 0 : i32
    %c0_i32_0 = arith.constant 0 : i32
    return %c0_i32 : i32
  }
  func.func @transform_1(%arg0: i32, %arg1: i32) -> (i32, i32, i32) {
    %c0_i32 = arith.constant 0 : i32
    %c0_i32_0 = arith.constant 0 : i32
    return %arg0, %c0_i32, %arg1 : i32, i32, i32
  }
  func.func @transform_2(%arg0: i32, %arg1: i32) -> (i32, i32) {
    %c0_i32 = arith.constant 0 : i32
    %c0_i32_0 = arith.constant 0 : i32
    %c0_i32_1 = arith.constant 0 : i32
    return %c0_i32, %c0_i32_0 : i32, i32
  }
  func.func @transform_3(%arg0: i32, %arg1: i32) -> (i32, i32) {
    %c0_i32 = arith.constant 0 : i32
    %c0_i32_0 = arith.constant 0 : i32
    %c0_i32_1 = arith.constant 0 : i32
    return %c0_i32, %c0_i32_0 : i32, i32
  }
  func.func @transform_4(%arg0: i32, %arg1: i32) -> (i32, i32, i32) {
    %c0_i32 = arith.constant 0 : i32
    %c0_i32_0 = arith.constant 0 : i32
    %c0_i32_1 = arith.constant 0 : i32
    return %arg0, %c0_i32, %c0_i32_0 : i32, i32, i32
  }
}

</mosaic_0001>

<bundles_post_ra>
// kernel: tpu_custom_call.1
= control target key start
LH: loop header
LB: loop body
LE: loop exit
PB: predicated region body
PF: predicated region fallthrough
CT: control target
= control target key end

     0   :  { %9 = vsyncpa [#allocation7], 0  ;;  %s2308_s0 = inlined_call_operand.vmem [shape: f32[2], index: 0, kind: input, shape index: {}]   ;;  %s2309_s1 = inlined_call_operand.hbm [shape: f32[2,32,2048], index: 1, kind: input, shape index: {}]   ;;  %s2310_s2 = inlined_call_operand.vmem [shape: f32[32,4], index: 2, kind: input, shape index: {}]   ;;  %s2311_s3 = inlined_call_operand.vmem [shape: f32[4,32], index: 3, kind: input, shape index: {}]   ;;  %s2312_s4 = inlined_call_operand.hbm [shape: f32[2,1,32], index: 4, kind: output, shape index: {}]  }
   0x1   :  { %10 = vsyncpa [#allocation5], 0 }
   0x2   :  { %12 = vsyncpa [#allocation5 + $0x1], 0 }
   0x3   :  { %13 = vsyncpa [#allocation6], 0 }
   0x4   :  { %15 = vsyncpa [#allocation6 + $0x1], 0  ;;  %s1812_s15 = smov 0   ;;  %s1814_s16 = smov 0  }
   0x5   :  { %s1816_s17 = smov 0   ;;  %s1818_s18 = smov 0  }
   0x6   :  { %s1820_s19 = smov 0   ;;  %s1822_s20 = smov 0  }
   0x7 LB: > { %s1507_s21 = sadd.s32 4294967295, %s1774_s20   ;;  %s1508_s22 = sadd.s32 4294967294, %s1774_s20   ;;  %s1774_s20 = sphi %s1822_s20, %s21_s20   ;;  %s1770_s19 = sphi %s1820_s19, %s2335_s19   ;;  %s1766_s18 = sphi %s1818_s18, %s2334_s18   ;;  %s1762_s17 = sphi %s1816_s17, %s2333_s17   ;;  %s1758_s16 = sphi %s1814_s16, %s2332_s16   ;;  %s1754_s15 = sphi %s1812_s15, %s2331_s15  }
   0x8   : > { %s63_s23 = sadd.s32 1, %s1762_s17  ;;  %p70_p0 = scmp.ne.s32.totalorder %s1762_s17, %s1758_s16 }
   0x9   : > { %p71_p1 = scmp.eq.s32.totalorder %s1774_s20, 0  ;;  %p76_p2 = scmp.ne.s32.totalorder %s1758_s16, %s1754_s15 }
   0xa   : > { %p1850_p3 = scmp.eq.s32.totalorder %s1507_s21, 0  ;;  %p142_p4 = scmp.eq.s32.totalorder %s1507_s21, 1 }
   0xb   : > { %p1854_p5 = por %p71_p1, %p70_p0  ;;  %p148_p6 = scmp.eq.s32.totalorder %s1508_s22, 1 }
   0xc   : > { %s2317_s24 = scalar_select %p1850_p3, 1, 0 }
   0xd   : > { %p1860_p7 = por %p1850_p3, %p76_p2  ;;  %p1864_p8 = por %p142_p4, %p70_p0 }
   0xe   : > { %p1868_p9 = por %p148_p6, %p76_p2  ;;  %p1509_p10 = scmp.ge.s32.totalorder %s1774_s20, 1 }
   0xf   : > { %s2319_s26 = scalar_select %p1860_p7, 1, 0 }
  0x10   : > { %s2320_s27 = scalar_select %p1864_p8, 1, 0 }
  0x11   : > { %s2321_s28 = scalar_select %p1868_p9, 1, 0 }
  0x12   : > { %p155_p11 = scmp.lt.s32.totalorder %s1774_s20, 3  ;;  %s168_s5 = sshll.u32 %s2308_s0, 4  ;;  %s169_s5 = int_to_ptr.vmem [resolvable:$true] %s168_s5 }
  0x13   : > { %p1577_p0 = scmp.lt.s32.totalorder %s1774_s20, 2  ;;  %s33_s9 = sadd.s32 1, %s1770_s19 }
  0x14   : > { %p1877_p12 = pnand %p1509_p10, %p155_p11  ;;  %p1898_p6 = scmp.ge.s32.totalorder %s33_s9, 2 }
  0x15   : > { %p1887_p2 = pnand %p1577_p0, %p1854_p5  ;;  %s185_s11 = sand.u32 1, %s1762_s17  }
  0x16   : > { %p1564_p1 = pneg %p1877_p12  ;;  %s1643_s12 = scalar_lea.vmem %s169_s5, 16 }
  0x17   : > { %p1644_p10 = scmp.ne.s32.totalorder %s169_s5, %s1643_s12  ;;  %p1651_p13 = scmp.lt.s32.totalorder %s169_s5, %s169_s5 }
  0x18   : > { %p1893_p4 = pnand %p1564_p1, %p1850_p3  ;;  %p1652_p9 = scmp.lt.s32.totalorder %s1643_s12, %s1643_s12 }
  0x1a   : > { %p1645_p11 = pneg %p1893_p4  ;;  %p1653_p8 = por %p1652_p9, %p1651_p13 }
  0x1c   : > { %p1646_p5 = pnand %p1645_p11, %p1644_p10 }
  0x1e   : > { %p1647_p0 = pneg %p1646_p5 }
  0x20   : > { %p1654_p1 = pnand %p1653_p8, %p1647_p0 }
  0x22   : > { %1657 = shalt.err (!%p1654_p1)
}
  0x23   : > { %s1776_s13 = smov [#allocation4]   ;;  %s2337_s9 = smov (%p1898_p6, %s33_s9), 0 }
  0x24   : > { %1567 = dma.vmem_to_smem (!%p1893_p4), %s169_s5, 16, %s1776_s13, [#allocation7]  }
  0x25   : > { %s1512_s14 = sshll.u32 %s185_s11, 9  ;;  %s58_s21 = ssub.s32 %s1770_s19, %s2337_s9 }
  0x26   : > { %p61_p9 = scmp.eq.s32.totalorder %s58_s21, 0  ;;  %s1526_s22 = sshll.u32 %s1770_s19, 13 }
  0x27   : > { %s1917_s30 = scalar_lea.hbm %s2309_s1, %s1526_s22  ;;  %s189_s8 = scalar_lea.vmem [#allocation8], %s1512_s14 }
  0x28   : > { %s198_s12 = sshll.u32 %s189_s8, 4  ;;  %s1926_s10 = scalar_lea.sflag [#allocation5], %s185_s11  ;;  %s1924_s12 = int_to_ptr.vmem [resolvable:$true] %s198_s12 }
  0x29   : > { %s1922_s5 = scalar_select %p61_p9, %s1762_s17, %s63_s23  }
  0x2a   : > { %s1658_s13 = scalar_lea.hbm %s1917_s30, 8192  ;;  %p1660_p13 = pneg %p1887_p2 }
  0x2b   : > { %p1659_p8 = scmp.ne.s32.totalorder %s1917_s30, %s1658_s13  ;;  %s1663_s14 = scalar_lea.hbm %s2309_s1, 16384 }
  0x2c   : > { %p1664_p10 = scmp.lt.u32.totalorder %s1917_s30, %s2309_s1  ;;  %p1665_p11 = scmp.lt.u32.totalorder %s1663_s14, %s1658_s13 }
  0x2d   : > { %p1661_p4 = pnand %p1660_p13, %p1659_p8  ;;  %p1667_p0 = scmp.lt.u32.totalorder %s1658_s13, %s1917_s30 }
  0x2e   : > { %p1666_p5 = por %p1665_p11, %p1664_p10 }
  0x2f   : > { %p1662_p6 = pneg %p1661_p4 }
  0x30   : > { %p1668_p1 = por %p1667_p0, %p1666_p5 }
  0x32   : > { %p1669_p9 = pnand %p1668_p1, %p1662_p6 }
  0x34   : > { %1672 = shalt.err (!%p1669_p9)
}
  0x35   : > { %s1673_s23 = scalar_lea.vmem %s1924_s12, 8192  ;;  %s1777_s11 = smov [#allocation8]  }
  0x36   : > { %p1674_p8 = scmp.ne.s32.totalorder %s1924_s12, %s1673_s23  ;;  %s1678_s8 = sshll.u32 %s1777_s11, 4  ;;  %s1679_s8 = int_to_ptr.vmem [resolvable:$false] %s1678_s8 }
  0x37   : > { %s1680_s21 = scalar_lea.vmem %s1679_s8, 16384  ;;  %p1681_p3 = scmp.lt.s32.totalorder %s1924_s12, %s1679_s8 }
  0x38   : > { %p1676_p4 = pnand %p1674_p8, %p1660_p13  ;;  %p1682_p10 = scmp.lt.s32.totalorder %s1680_s21, %s1673_s23 }
  0x3a   : > { %p1677_p7 = pneg %p1676_p4  ;;  %p1683_p11 = por %p1682_p10, %p1681_p3 }
  0x3c   : > { %p1684_p5 = pnand %p1683_p11, %p1677_p7 }
  0x3e   : > { %1687 = shalt.err (!%p1684_p5)
}
  0x3f   : > { %s1778_s13 = smov 2048   ;;  %s1779_s22 = smov 128  }
  0x40   : > { %1571 = dma.hbm_to_vmem [thread:$0]  (!%p1887_p2), %s1917_s30, 8192, %s1924_s12, %s1926_s10, %s1778_s13, %s1778_s13, %s1779_s22  }
  0x41   : > { %210 = sbr.rel (%p1877_p12) target bundleno = 922 (0x39a), region = 36  ;;  %p2326_p13 = scmp.ne.s32.totalorder (!%p1877_p12), %s2317_s24, 0 }
  0x48   : > { %1741 = dma.done.wait (%p2326_p13), [#allocation7], 16  }
  0x49   : > { %1743 = vsyncadd (%p2326_p13), [#allocation7], 4294967280  ;;  %s1961_s14 = sand.u32 1, %s1758_s16   ;;  %p2327_p3 = scmp.ne.s32.totalorder %s2319_s26, 0 }
  0x4a   : > { %s1517_s25 = sshll.u32 %s1961_s14, 9  ;;  %s217_s29 = scalar_lea.sflag [#allocation5], %s1961_s14 }
  0x4b   : > { %s1965_s23 = scalar_lea.vmem [#allocation8], %s1517_s25 }
  0x4c   : > { %1745 = dma.done.wait (%p2327_p3), %s217_s29, 8192  }
  0x4d   : > { %1747 = vsyncadd (%p2327_p3), %s217_s29, 4294959104 }
  0x4e   : > { %225 = sfence }
  0x4f   : > { %v1972_v0 = vld [vmem:[%s1965_s23] sm:$0xff]  ;;  %v1975_v1 = vld [vmem:[%s1965_s23 + $0x8] sm:$0xff]  ;;  %v255_v2 = vld [vmem:[%s1965_s23 + $0x10] sm:$0xff]  ;;  %vm250_vm0 = vcmask 253952   ;;  %vm1785_vm1 = vmmov 0   ;;  %vm737_vm2 = vcmask 130112  }
  0x50   : > { %v256_v3 = vld [vmem:[%s1965_s23 + $0x18] sm:$0xff]  ;;  %v318_v4 = vadd.f32 %v1975_v1, %v1972_v0  ;;  %v257_v6 = vld [vmem:[%s1965_s23 + $0x20] sm:$0xff]  ;;  %v258_v9 = vld [vmem:[%s1965_s23 + $0x28] sm:$0xff]  ;;  %vm744_vm3 = vcmask 195712   ;;  %vm751_vm4 = vcmask 261312   ;;  %vm1233_vm5 = vcmask 1040384  }
  0x51   : > { %v773_v5 = vmax.f32 %v256_v3, %v255_v2  ;;  %v1984_v11 = vld [vmem:[%s1965_s23 + $0x80] sm:$0xff]  ;;  %v1987_v12 = vld [vmem:[%s1965_s23 + $0x88] sm:$0xff]  ;;  %v271_v14 = vld [vmem:[%s1965_s23 + $0x90] sm:$0xff]  ;;  %vm1235_vm6 = vcmask 261120   ;;  %vm1324_vm7 = vcmask 1043456   ;;  %s1520_s13 = sld [smem:[#allocation4 + $0x1]] }
  0x52   : > { %v319_v7 = vadd.f32 %v318_v4, %v255_v2  ;;  %v272_v15 = vld [vmem:[%s1965_s23 + $0x98] sm:$0xff]  ;;  %v335_v16 = vadd.f32 %v1987_v12, %v1984_v11  ;;  %v259_v17 = vld [vmem:[%s1965_s23 + $0x30] sm:$0xff]  ;;  %v273_v21 = vld [vmem:[%s1965_s23 + $0xa0] sm:$0xff]  ;;  %s1310_s22 = sld [smem:[#allocation4]]  ;;  %vm1320_vm8 = vcmask 31744   ;;  %s1523_s25 = sshll.u32 %s1766_s18, 4 }
  0x53   : > { %v774_v8 = vmax.f32 %v773_v5, %v257_v6  ;;  %v790_v19 = vmax.f32 %v272_v15, %v271_v14  ;;  %v260_v23 = vld [vmem:[%s1965_s23 + $0x38] sm:$0xff]  ;;  %v261_v27 = vld [vmem:[%s1965_s23 + $0x40] sm:$0xff]  ;;  %v274_v28 = vld [vmem:[%s1965_s23 + $0xa8] sm:$0xff]  ;;  %s244_s29 = scalar_lea.vmem [#allocation9], %s1961_s14  ;;  %s2258_s6 = scalar_lea.hbm %s2312_s4, %s1523_s25 }
  0x54   : > { %v320_v10 = vadd.f32 %v319_v7, %v256_v3  ;;  %v336_v22 = vadd.f32 %v335_v16, %v271_v14  ;;  %v1999_v30 = vld [vmem:[%s1965_s23 + $0x100] sm:$0xff]  ;;  %v2002_v33 = vld [vmem:[%s1965_s23 + $0x108] sm:$0xff]  ;;  %v287_v34 = vld [vmem:[%s1965_s23 + $0x110] sm:$0xff]  ;;  %s1406_s7 = scalar_lea.sflag [#allocation6], %s1961_s14  ;;  %p2328_p12 = scmp.ne.s32.totalorder %s2320_s27, 0 }
  0x55   : > { %v775_v13 = vmax.f32 %v774_v8, %v258_v9  ;;  %v791_v25 = vmax.f32 %v790_v19, %v273_v21  ;;  %v288_v35 = vld [vmem:[%s1965_s23 + $0x118] sm:$0xff]  ;;  %v275_v37 = vld [vmem:[%s1965_s23 + $0xb0] sm:$0xff]  ;;  %v352_v40 = vadd.f32 %v2002_v33, %v1999_v30  ;;  %v262_v41 = vld [vmem:[%s1965_s23 + $0x48] sm:$0xff]  ;;  %s1786_s18 = smov [#allocation9]  }
  0x56   : > { %v321_v18 = vadd.f32 %v320_v10, %v257_v6  ;;  %v337_v29 = vadd.f32 %v336_v22, %v272_v15  ;;  %v807_v39 = vmax.f32 %v288_v35, %v287_v34  ;;  %v289_v44 = vld [vmem:[%s1965_s23 + $0x120] sm:$0xff]  ;;  %v276_v46 = vld [vmem:[%s1965_s23 + $0xb8] sm:$0xff]  ;;  %v263_v50 = vld [vmem:[%s1965_s23 + $0x50] sm:$0xff]  ;;  %s1692_s12 = sshll.u32 %s1786_s18, 4  ;;  %s1693_s12 = int_to_ptr.vmem [resolvable:$false] %s1692_s12 }
  0x57   : > { %v776_v20 = vmax.f32 %v775_v13, %v259_v17  ;;  %v792_v32 = vmax.f32 %v791_v25, %v274_v28  ;;  %v353_v49 = vadd.f32 %v352_v40, %v287_v34  ;;  %v277_v53 = vld [vmem:[%s1965_s23 + $0xc0] sm:$0xff]  ;;  %v290_v54 = vld [vmem:[%s1965_s23 + $0x128] sm:$0xff]  ;;  %v303_v61 = vld [vmem:[%s1965_s23 + $0x190] sm:$0xff]  ;;  %s1694_s10 = scalar_lea.vmem %s1693_s12, 32 }
  0x58   : > { %v322_v24 = vadd.f32 %v321_v18, %v258_v9  ;;  %v338_v38 = vadd.f32 %v337_v29, %v273_v21  ;;  %v808_v48 = vmax.f32 %v807_v39, %v289_v44  ;;  %v2016_v59 = vld [vmem:[%s1965_s23 + $0x180] sm:$0xff]  ;;  %v2019_v60 = vld [vmem:[%s1965_s23 + $0x188] sm:$0xff]  ;;  %v264_v62 = vld [vmem:[%s1965_s23 + $0x58] sm:$0xff] }
  0x59   : > { %v777_v26 = vmax.f32 %v776_v20, %v260_v23  ;;  %v793_v43 = vmax.f32 %v792_v32, %v275_v37  ;;  %v354_v58 = vadd.f32 %v353_v49, %v288_v35  ;;  %v291_v3 = vld [vmem:[%s1965_s23 + $0x130] sm:$0xff]  ;;  %v369_v4 = vadd.f32 %v2019_v60, %v2016_v59  ;;  %v278_v6 = vld [vmem:[%s1965_s23 + $0xc8] sm:$0xff]  ;;  %v304_v10 = vld [vmem:[%s1965_s23 + $0x198] sm:$0xff] }
  0x5a   : > { %v323_v31 = vadd.f32 %v322_v24, %v259_v17  ;;  %v339_v47 = vadd.f32 %v338_v38, %v274_v28  ;;  %v809_v57 = vmax.f32 %v808_v48, %v290_v54  ;;  %v265_v13 = vld [vmem:[%s1965_s23 + $0x60] sm:$0xff]  ;;  %v292_v16 = vld [vmem:[%s1965_s23 + $0x138] sm:$0xff]  ;;  %v824_v17 = vmax.f32 %v304_v10, %v303_v61  ;;  %v279_v25 = vld [vmem:[%s1965_s23 + $0xd0] sm:$0xff] }
  0x5b   : > { %v778_v36 = vmax.f32 %v777_v26, %v261_v27  ;;  %v794_v52 = vmax.f32 %v793_v43, %v276_v46  ;;  %v355_v9 = vadd.f32 %v354_v58, %v289_v44  ;;  %v370_v18 = vadd.f32 %v369_v4, %v303_v61  ;;  %v293_v26 = vld [vmem:[%s1965_s23 + $0x140] sm:$0xff]  ;;  %v266_v29 = vld [vmem:[%s1965_s23 + $0x68] sm:$0xff]  ;;  %v280_v38 = vld [vmem:[%s1965_s23 + $0xd8] sm:$0xff] }
  0x5c   : > { %v324_v42 = vadd.f32 %v323_v31, %v260_v23  ;;  %v340_v56 = vadd.f32 %v339_v47, %v275_v37  ;;  %v810_v8 = vmax.f32 %v809_v57, %v291_v3  ;;  %v305_v23 = vld [vmem:[%s1965_s23 + $0x1a0] sm:$0xff]  ;;  %v306_v35 = vld [vmem:[%s1965_s23 + $0x1a8] sm:$0xff]  ;;  %v267_v43 = vld [vmem:[%s1965_s23 + $0x70] sm:$0xff] }
  0x5d   : > { %v779_v45 = vmax.f32 %v778_v36, %v262_v41  ;;  %v795_v2 = vmax.f32 %v794_v52, %v277_v53  ;;  %v356_v22 = vadd.f32 %v355_v9, %v290_v54  ;;  %v371_v28 = vadd.f32 %v370_v18, %v304_v10  ;;  %v294_v39 = vld [vmem:[%s1965_s23 + $0x148] sm:$0xff]  ;;  %v307_v47 = vld [vmem:[%s1965_s23 + $0x1b0] sm:$0xff]  ;;  %v281_v49 = vld [vmem:[%s1965_s23 + $0xe0] sm:$0xff] }
  0x5e   : > { %v325_v51 = vadd.f32 %v324_v42, %v261_v27  ;;  %v341_v7 = vadd.f32 %v340_v56, %v276_v46  ;;  %v811_v21 = vmax.f32 %v810_v8, %v292_v16  ;;  %v825_v27 = vmax.f32 %v824_v17, %v305_v23  ;;  %v308_v57 = vld [vmem:[%s1965_s23 + $0x1b8] sm:$0xff]  ;;  %v309_v8 = vld [vmem:[%s1965_s23 + $0x1c0] sm:$0xff]  ;;  %v283_v10 = vld [vmem:[%s1965_s23 + $0xf0] sm:$0xff] }
  0x5f   : > { %v780_v55 = vmax.f32 %v779_v45, %v263_v50  ;;  %v796_v15 = vmax.f32 %v795_v2, %v278_v6  ;;  %v357_v34 = vadd.f32 %v356_v22, %v291_v3  ;;  %v298_v22 = vld [vmem:[%s1965_s23 + $0x168] sm:$0xff] }
  0x60   : > { %v326_v63 = vadd.f32 %v325_v51, %v262_v41  ;;  %v342_v20 = vadd.f32 %v341_v7, %v277_v53  ;;  %v812_v32 = vmax.f32 %v811_v21, %v293_v26  ;;  %v826_v40 = vmax.f32 %v825_v27, %v306_v35  ;;  %v268_v53 = vld [vmem:[%s1965_s23 + $0x78] sm:$0xff] }
  0x61   : > { %v781_v5 = vmax.f32 %v780_v55, %v264_v62  ;;  %v797_v37 = vmax.f32 %v796_v15, %v279_v25  ;;  %v372_v41 = vadd.f32 %v371_v28, %v305_v23  ;;  %v358_v46 = vadd.f32 %v357_v34, %v292_v16  ;;  %v284_v21 = vld [vmem:[%s1965_s23 + $0xf8] sm:$0xff] }
  0x62   : > { %v327_v14 = vadd.f32 %v326_v63, %v263_v50  ;;  %v343_v31 = vadd.f32 %v342_v20, %v278_v6  ;;  %v813_v45 = vmax.f32 %v812_v32, %v294_v39  ;;  %v295_v50 = vld [vmem:[%s1965_s23 + $0x150] sm:$0xff]  ;;  %v827_v51 = vmax.f32 %v826_v40, %v307_v47  ;;  %v296_v63 = vld [vmem:[%s1965_s23 + $0x158] sm:$0xff] }
  0x63   : > { %v782_v19 = vmax.f32 %v781_v5, %v265_v13  ;;  %v373_v52 = vadd.f32 %v372_v41, %v306_v35  ;;  %v359_v56 = vadd.f32 %v358_v46, %v293_v26  ;;  %v798_v61 = vmax.f32 %v797_v37, %v280_v38  ;;  %v299_v32 = vld [vmem:[%s1965_s23 + $0x170] sm:$0xff]  ;;  %v300_v41 = vld [vmem:[%s1965_s23 + $0x178] sm:$0xff] }
  0x64   : > { %v328_v24 = vadd.f32 %v327_v14, %v264_v62  ;;  %v344_v44 = vadd.f32 %v343_v31, %v279_v25  ;;  %v814_v55 = vmax.f32 %v813_v45, %v295_v50  ;;  %v282_v62 = vld [vmem:[%s1965_s23 + $0xe8] sm:$0xff]  ;;  %v828_v2 = vmax.f32 %v827_v51, %v308_v57  ;;  %v311_v31 = vld [vmem:[%s1965_s23 + $0x1d0] sm:$0xff] }
  0x65   : > { %v783_v42 = vmax.f32 %v782_v19, %v266_v29  ;;  %v374_v3 = vadd.f32 %v373_v52, %v307_v47  ;;  %v360_v7 = vadd.f32 %v359_v56, %v294_v39  ;;  %v310_v19 = vld [vmem:[%s1965_s23 + $0x1c8] sm:$0xff]  ;;  %v799_v20 = vmax.f32 %v798_v61, %v281_v49  ;;  %v312_v39 = vld [vmem:[%s1965_s23 + $0x1d8] sm:$0xff] }
  0x66   : > { %v329_v36 = vadd.f32 %v328_v24, %v265_v13  ;;  %v345_v54 = vadd.f32 %v344_v44, %v280_v38  ;;  %v815_v6 = vmax.f32 %v814_v55, %v296_v63  ;;  %v297_v13 = vld [vmem:[%s1965_s23 + $0x160] sm:$0xff]  ;;  %v829_v14 = vmax.f32 %v828_v2, %v309_v8  ;;  %v315_v55 = vld [vmem:[%s1965_s23 + $0x1f0] sm:$0xff] }
  0x67   : > { %v784_v4 = vmax.f32 %v783_v42, %v267_v43  ;;  %v375_v15 = vadd.f32 %v374_v3, %v308_v57  ;;  %v361_v18 = vadd.f32 %v360_v7, %v295_v50  ;;  %v772_v25 = vmax.f32 %v1972_v0, %v1975_v1  ;;  %v313_v44 = vld [vmem:[%s1965_s23 + $0x1e0] sm:$0xff]  ;;  %v314_v50 = vld [vmem:[%s1965_s23 + $0x1e8] sm:$0xff] }
  0x68   : > { %v330_v48 = vadd.f32 %v329_v36, %v266_v29  ;;  %v346_v5 = vadd.f32 %v345_v54, %v281_v49  ;;  %v816_v17 = vmax.f32 %v815_v6, %v297_v13  ;;  %v830_v23 = vmax.f32 %v829_v14, %v310_v19 }
  0x69   : > { %v376_v24 = vadd.f32 %v375_v15, %v309_v8  ;;  %v785_v26 = vmax.f32 %v784_v4, %v268_v53  ;;  %v362_v29 = vadd.f32 %v361_v18, %v296_v63  ;;  %v800_v40 = vmax.f32 %v799_v20, %v282_v62 }
  0x6a   : > { %v331_v58 = vadd.f32 %v330_v48, %v267_v43  ;;  %v347_v16 = vadd.f32 %v346_v5, %v282_v62  ;;  %v817_v28 = vmax.f32 %v816_v17, %v298_v22  ;;  %v831_v34 = vmax.f32 %v830_v23, %v311_v31 }
  0x6b   : > { %v377_v35 = vadd.f32 %v376_v24, %v310_v19  ;;  %v363_v38 = vadd.f32 %v362_v29, %v297_v13  ;;  %v786_v45 = vmax.f32 %v785_v26, %v772_v25  ;;  %v806_v46 = vmax.f32 %v1999_v30, %v2002_v33 }
  0x6c   : > { %v332_v9 = vadd.f32 %v331_v58, %v268_v53  ;;  %v348_v27 = vadd.f32 %v347_v16, %v283_v10  ;;  %v818_v37 = vmax.f32 %v817_v28, %v299_v32  ;;  %v832_v42 = vmax.f32 %v831_v34, %v312_v39  ;;  %v316_v58 = vld [vmem:[%s1965_s23 + $0x1f8] sm:$0xff]  ;;  %s1418_s23 = sshll.u32 %s244_s29, 4  ;;  %s2260_s23 = int_to_ptr.vmem [resolvable:$true] %s1418_s23 }
  0x6d   : > { %v378_v43 = vadd.f32 %v377_v35, %v311_v31  ;;  %v364_v1 = vadd.f32 %v363_v38, %v298_v22  ;;  %v801_v51 = vmax.f32 %v800_v40, %v283_v10  ;;  %v789_v30 = vmax.f32 %v1984_v11, %v1987_v12  ;;  %s1688_s30 = scalar_lea.vmem %s2260_s23, 16  ;;  %p1695_p0 = scmp.lt.s32.totalorder %s2260_s23, %s1693_s12 }
  0x6e   : > { %333 = vadd.xlane.f32.xlu0 %v332_v9  ;;  %v349_v36 = vadd.f32 %v348_v27, %v284_v21  ;;  %v819_v0 = vmax.f32 %v818_v37, %v300_v41  ;;  %v833_v47 = vmax.f32 %v832_v42, %v313_v44  ;;  %v823_v4 = vmax.f32 %v2016_v59, %v2019_v60  ;;  %p1689_p7 = scmp.ne.s32.totalorder %s2260_s23, %s1688_s30  ;;  %p1696_p1 = scmp.lt.s32.totalorder %s1694_s10, %s1688_s30 }
  0x6f   : > { %v379_v48 = vadd.f32 %v378_v43, %v312_v39  ;;  %v365_v49 = vadd.f32 %v364_v1, %v299_v32  ;;  %v802_v61 = vmax.f32 %v801_v51, %v284_v21  ;;  %v1780_v6 = vmov 0  }
  0x70   : > { %v834_v52 = vmax.f32 %v833_v47, %v314_v50  ;;  %v820_v56 = vmax.f32 %v819_v0, %v806_v46  ;;  %1637 = vset.pattern.permute.xlu0 %v1780_v6  ;;  %1638 = vset.pattern.permute.xlu1 %v1780_v6  ;;  %v390_v7 = vlaneseq  ;;  %v1781_v8 = vmov 1966171168   ;;  %p1690_p2 = pnand %p1689_p7, %p2328_p12  ;;  %p1697_p9 = por %p1696_p1, %p1695_p0 }
  0x71   : > { %v380_v53 = vadd.f32 %v379_v48, %v313_v44  ;;  %v366_v54 = vadd.f32 %v365_v49, %v300_v41  ;;  %v803_v3 = vmax.f32 %v802_v61, %v789_v30  ;;  %v523_v9 = vunpack.c.l.s4 %v1781_v8 }
  0x72   : > { %350 = vadd.xlane.f32.xlu0 %v349_v36  ;;  %v835_v62 = vmax.f32 %v834_v52, %v315_v55  ;;  %v2068_v10 = vshrl.u32 %v390_v7, 7  ;;  %p1691_p6 = pneg %p1690_p2 }
  0x73   : > { %v381_v57 = vadd.f32 %v380_v53, %v314_v50  ;;  %367 = vadd.xlane.f32.xlu1 %v366_v54  ;;  %v524_v11 = vunpack.c.0.s8 %v523_v9 }
  0x74   : > { %v836_v2 = vmax.f32 %v835_v62, %v316_v58  ;;  %v2071_v12 = vsub.s32 0, %v2068_v10  ;;  %v2074_v13 = vsub.s32 1, %v2068_v10  ;;  %v2077_v59 = vsub.s32 2, %v2068_v10  ;;  %p1698_p8 = pnand %p1697_p9, %p1691_p6 }
  0x75   : > { %v382_v63 = vadd.f32 %v381_v57, %v315_v55  ;;  %v2080_v60 = vsub.s32 3, %v2068_v10  ;;  %v2083_v14 = vsub.s32 4, %v2068_v10  ;;  %v2086_v15 = vsub.s32 5, %v2068_v10 }
  0x76   : > { %787 = vmax.xlane.f32.xlu0 %v786_v45  ;;  %v837_v5 = vmax.f32 %v836_v2, %v823_v4  ;;  %v2089_v16 = vsub.s32 6, %v2068_v10  ;;  %v2092_v17 = vsub.s32 7, %v2068_v10  ;;  %v2095_v19 = vsub.s32 %v524_v11, %v2068_v10 }
  0x77   : > { %v383_v33 = vadd.f32 %v382_v63, %v316_v58 }
  0x79   : > { %384 = vadd.xlane.f32.xlu1 %v383_v33 }
  0x7a   : > { %821 = vmax.xlane.f32.xlu0 %v820_v56 }
  0x7d   : > { %804 = vmax.xlane.f32.xlu1 %v803_v3 }
  0x81   : > { %838 = vmax.xlane.f32.xlu1 %v837_v5 }
  0xfb   : > { %v334_v18 = vpop.xlane.xlu0 %333 }
  0xfc   : > { %v393_v20 = vrot.slane %v334_v18, %v2071_v12  ;;  %v397_v21 = vrot.slane %v334_v18, %v2074_v13  ;;  %v401_v22 = vrot.slane %v334_v18, %v2077_v59  ;;  %v405_v23 = vrot.slane %v334_v18, %v2080_v60 }
  0xfd   : > { %v409_v24 = vrot.slane %v334_v18, %v2083_v14  ;;  %v413_v25 = vrot.slane %v334_v18, %v2086_v15  ;;  %v417_v26 = vrot.slane %v334_v18, %v2089_v16  ;;  %v421_v27 = vrot.slane %v334_v18, %v2092_v17 }
  0xfe   : > { %v518_v28 = vcombine.low %v393_v20, %v397_v21  ;;  %v519_v29 = vcombine.low %v401_v22, %v405_v23 }
  0xff   : > { %v520_v31 = vcombine.low %v409_v24, %v413_v25  ;;  %v521_v32 = vcombine.low %v417_v26, %v421_v27  ;;  %v351_v34 = vpop.xlane.xlu0 %350 }
 0x100   : > { %v528_v35 = vrot.slane %v518_v28, %v2095_v19  ;;  %v535_v36 = vrot.slane %v519_v29, %v2095_v19  ;;  %v425_v39 = vrot.slane %v351_v34, %v2071_v12  ;;  %v429_v40 = vrot.slane %v351_v34, %v2074_v13  ;;  %v368_v55 = vpop.xlane.xlu1 %367 }
 0x101   : > { %v542_v37 = vrot.slane %v520_v31, %v2095_v19  ;;  %v549_v38 = vrot.slane %v521_v32, %v2095_v19  ;;  %v433_v42 = vrot.slane %v351_v34, %v2077_v59  ;;  %v437_v43 = vrot.slane %v351_v34, %v2080_v60 }
 0x102   : > { %v550_v41 = vcombine.low %v528_v35, %v535_v36  ;;  %v441_v0 = vrot.slane %v351_v34, %v2083_v14  ;;  %v445_v44 = vrot.slane %v351_v34, %v2086_v15  ;;  %v449_v45 = vrot.slane %v351_v34, %v2089_v16 }
 0x103   : > { %v551_v1 = vcombine.low %v542_v37, %v549_v38  ;;  %v453_v46 = vrot.slane %v351_v34, %v2092_v17  ;;  %v2118_v48 = vpop.xlane.xlu0 %787  ;;  %v567_v49 = vcombine.low %v425_v39, %v429_v40  ;;  %v568_v50 = vcombine.low %v433_v42, %v437_v43 }
 0x104   : > { %v558_v47 = vrot.slane %v550_v41, %v2095_v19  ;;  %v569_v52 = vcombine.low %v441_v0, %v445_v44  ;;  %v847_v54 = vrot.slane %v2118_v48, %v2071_v12  ;;  %v851_v58 = vrot.slane %v2118_v48, %v2074_v13 }
 0x105   : > { %v565_v51 = vrot.slane %v551_v1, %v2095_v19  ;;  %v570_v53 = vcombine.low %v449_v45, %v453_v46  ;;  %v577_v56 = vrot.slane %v567_v49, %v2095_v19  ;;  %v584_v57 = vrot.slane %v568_v50, %v2095_v19 }
 0x106   : > { %v855_v61 = vrot.slane %v2118_v48, %v2077_v59  ;;  %v591_v63 = vrot.slane %v569_v52, %v2095_v19  ;;  %v457_v33 = vrot.slane %v368_v55, %v2071_v12  ;;  %v461_v3 = vrot.slane %v368_v55, %v2074_v13  ;;  %v385_v23 = vpop.xlane.xlu1 %384 }
 0x107   : > { %v566_v62 = vcombine.low %v558_v47, %v565_v51  ;;  %v598_v30 = vrot.slane %v570_v53, %v2095_v19  ;;  %v599_v2 = vcombine.low %v577_v56, %v584_v57  ;;  %v465_v4 = vrot.slane %v368_v55, %v2077_v59 }
 0x108   : > { %v469_v5 = vrot.slane %v368_v55, %v2080_v60  ;;  %v473_v8 = vrot.slane %v368_v55, %v2083_v14  ;;  %v477_v9 = vrot.slane %v368_v55, %v2086_v15  ;;  %v481_v11 = vrot.slane %v368_v55, %v2089_v16 }
 0x109   : > { %715 = vperm.xlu0 %1637, %v566_v62   ;;  %v600_v6 = vcombine.low %v591_v63, %v598_v30  ;;  %v607_v18 = vrot.slane %v599_v2, %v2095_v19  ;;  %v485_v20 = vrot.slane %v368_v55, %v2092_v17  ;;  %v616_v21 = vcombine.low %v457_v33, %v461_v3 }
 0x10a   : > { %v617_v22 = vcombine.low %v465_v4, %v469_v5  ;;  %v618_v25 = vcombine.low %v473_v8, %v477_v9  ;;  %v859_v26 = vrot.slane %v2118_v48, %v2080_v60  ;;  %v863_v27 = vrot.slane %v2118_v48, %v2083_v14  ;;  %v805_v53 = vpop.xlane.xlu1 %804 }
 0x10b   : > { %v614_v24 = vrot.slane %v600_v6, %v2095_v19  ;;  %v619_v28 = vcombine.low %v481_v11, %v485_v20  ;;  %v626_v29 = vrot.slane %v616_v21, %v2095_v19  ;;  %v489_v32 = vrot.slane %v385_v23, %v2071_v12  ;;  %v822_v20 = vpop.xlane.xlu0 %821 }
 0x10c   : > { %v633_v31 = vrot.slane %v617_v22, %v2095_v19  ;;  %v640_v35 = vrot.slane %v618_v25, %v2095_v19  ;;  %v493_v36 = vrot.slane %v385_v23, %v2074_v13  ;;  %v497_v37 = vrot.slane %v385_v23, %v2077_v59 }
 0x10d   : > { %v615_v34 = vcombine.low %v607_v18, %v614_v24  ;;  %v647_v38 = vrot.slane %v619_v28, %v2095_v19  ;;  %v501_v40 = vrot.slane %v385_v23, %v2080_v60  ;;  %v505_v41 = vrot.slane %v385_v23, %v2083_v14 }
 0x10e   : > { %v648_v39 = vcombine.low %v626_v29, %v633_v31  ;;  %v509_v42 = vrot.slane %v385_v23, %v2086_v15  ;;  %v513_v43 = vrot.slane %v385_v23, %v2089_v16  ;;  %v517_v0 = vrot.slane %v385_v23, %v2092_v17 }
 0x10f   : > { %718 = vperm.xlu1 %1638, %v615_v34   ;;  %v665_v1 = vcombine.low %v489_v32, %v493_v36  ;;  %v649_v44 = vcombine.low %v640_v35, %v647_v38  ;;  %v666_v46 = vcombine.low %v497_v37, %v501_v40  ;;  %v867_v47 = vrot.slane %v2118_v48, %v2086_v15 }
 0x110   : > { %v656_v45 = vrot.slane %v648_v39, %v2095_v19  ;;  %v667_v49 = vcombine.low %v505_v41, %v509_v42  ;;  %v668_v50 = vcombine.low %v513_v43, %v517_v0  ;;  %v871_v52 = vrot.slane %v2118_v48, %v2089_v16  ;;  %v839_v43 = vpop.xlane.xlu1 %838 }
 0x111   : > { %v675_v51 = vrot.slane %v665_v1, %v2095_v19  ;;  %v663_v55 = vrot.slane %v649_v44, %v2095_v19  ;;  %v682_v56 = vrot.slane %v666_v46, %v2095_v19  ;;  %v875_v57 = vrot.slane %v2118_v48, %v2092_v17 }
 0x112   : > { %v972_v62 = vcombine.low %v847_v54, %v851_v58  ;;  %v689_v63 = vrot.slane %v667_v49, %v2095_v19  ;;  %v696_v30 = vrot.slane %v668_v50, %v2095_v19  ;;  %v973_v33 = vcombine.low %v855_v61, %v859_v26 }
 0x113   : > { %v974_v2 = vcombine.low %v863_v27, %v867_v47  ;;  %v664_v3 = vcombine.low %v656_v45, %v663_v55  ;;  %v697_v4 = vcombine.low %v675_v51, %v682_v56  ;;  %v975_v5 = vcombine.low %v871_v52, %v875_v57 }
 0x114   : > { %v982_v6 = vrot.slane %v972_v62, %v2095_v19  ;;  %v698_v8 = vcombine.low %v689_v63, %v696_v30  ;;  %v989_v9 = vrot.slane %v973_v33, %v2095_v19  ;;  %v879_v18 = vrot.slane %v805_v53, %v2071_v12 }
 0x115   : > { %v996_v11 = vrot.slane %v974_v2, %v2095_v19  ;;  %721 = vperm.xlu1 %1638, %v664_v3   ;;  %v705_v48 = vrot.slane %v697_v4, %v2095_v19  ;;  %v1003_v54 = vrot.slane %v975_v5, %v2095_v19  ;;  %v883_v58 = vrot.slane %v805_v53, %v2074_v13 }
 0x116   : > { %v887_v61 = vrot.slane %v805_v53, %v2077_v59  ;;  %v712_v21 = vrot.slane %v698_v8, %v2095_v19  ;;  %v1004_v22 = vcombine.low %v982_v6, %v989_v9  ;;  %v891_v23 = vrot.slane %v805_v53, %v2080_v60 }
 0x117   : > { %v895_v24 = vrot.slane %v805_v53, %v2083_v14  ;;  %v1005_v25 = vcombine.low %v996_v11, %v1003_v54  ;;  %v899_v26 = vrot.slane %v805_v53, %v2086_v15  ;;  %v903_v27 = vrot.slane %v805_v53, %v2089_v16 }
 0x118   : > { %v907_v28 = vrot.slane %v805_v53, %v2092_v17  ;;  %v713_v29 = vcombine.low %v705_v48, %v712_v21  ;;  %v1012_v31 = vrot.slane %v1004_v22, %v2095_v19  ;;  %v1021_v32 = vcombine.low %v879_v18, %v883_v58 }
 0x119   : > { %v1022_v34 = vcombine.low %v887_v61, %v891_v23  ;;  %v1019_v35 = vrot.slane %v1005_v25, %v2095_v19  ;;  %v1023_v36 = vcombine.low %v895_v24, %v899_v26  ;;  %v911_v38 = vrot.slane %v822_v20, %v2071_v12 }
 0x11a   : > { %v1024_v37 = vcombine.low %v903_v27, %v907_v28  ;;  %724 = vperm.xlu1 %1638, %v713_v29   ;;  %v1031_v39 = vrot.slane %v1021_v32, %v2095_v19  ;;  %v915_v41 = vrot.slane %v822_v20, %v2074_v13  ;;  %v919_v42 = vrot.slane %v822_v20, %v2077_v59  ;;  %v1223_v32 = vld [vmem:[%s2310_s2 + $0x8] sm:$0xff] }
 0x11b   : > { %v1038_v40 = vrot.slane %v1022_v34, %v2095_v19  ;;  %v1020_v0 = vcombine.low %v1012_v31, %v1019_v35  ;;  %v1045_v1 = vrot.slane %v1023_v36, %v2095_v19  ;;  %v923_v45 = vrot.slane %v822_v20, %v2080_v60  ;;  %v1222_v31 = vld [vmem:[%s2310_s2] sm:$0xff]  ;;  %v1224_v35 = vld [vmem:[%s2310_s2 + $0x10] sm:$0xff]  ;;  %v1225_v36 = vld [vmem:[%s2310_s2 + $0x18] sm:$0xff] }
 0x11c   : > { %v1052_v44 = vrot.slane %v1024_v37, %v2095_v19  ;;  %v927_v47 = vrot.slane %v822_v20, %v2083_v14  ;;  %v931_v49 = vrot.slane %v822_v20, %v2086_v15  ;;  %v935_v50 = vrot.slane %v822_v20, %v2089_v16 }
 0x11d   : > { %v1053_v46 = vcombine.low %v1031_v39, %v1038_v40  ;;  %v939_v52 = vrot.slane %v822_v20, %v2092_v17  ;;  %v1070_v53 = vcombine.low %v911_v38, %v915_v41  ;;  %v1071_v55 = vcombine.low %v919_v42, %v923_v45 }
 0x11e   : > { %v1054_v51 = vcombine.low %v1045_v1, %v1052_v44  ;;  %1169 = vperm.xlu1 %1638, %v1020_v0   ;;  %v1072_v57 = vcombine.low %v927_v47, %v931_v49  ;;  %v943_v62 = vrot.slane %v839_v43, %v2071_v12  ;;  %v947_v63 = vrot.slane %v839_v43, %v2074_v13 }
 0x11f   : > { %v1061_v56 = vrot.slane %v1053_v46, %v2095_v19  ;;  %v1073_v33 = vcombine.low %v935_v50, %v939_v52  ;;  %v1080_v2 = vrot.slane %v1070_v53, %v2095_v19  ;;  %v1087_v3 = vrot.slane %v1071_v55, %v2095_v19 }
 0x120   : > { %v1068_v30 = vrot.slane %v1054_v51, %v2095_v19  ;;  %v1094_v4 = vrot.slane %v1072_v57, %v2095_v19  ;;  %v951_v5 = vrot.slane %v839_v43, %v2077_v59  ;;  %v955_v6 = vrot.slane %v839_v43, %v2080_v60 }
 0x121   : > { %v959_v8 = vrot.slane %v839_v43, %v2083_v14  ;;  %v1101_v12 = vrot.slane %v1073_v33, %v2095_v19  ;;  %v1102_v11 = vcombine.low %v1080_v2, %v1087_v3  ;;  %v963_v13 = vrot.slane %v839_v43, %v2086_v15 }
 0x122   : > { %v1069_v9 = vcombine.low %v1061_v56, %v1068_v30  ;;  %v967_v18 = vrot.slane %v839_v43, %v2089_v16  ;;  %v971_v48 = vrot.slane %v839_v43, %v2092_v17  ;;  %v1119_v54 = vcombine.low %v943_v62, %v947_v63 }
 0x123   : > { %v1120_v58 = vcombine.low %v951_v5, %v955_v6  ;;  %v1103_v61 = vcombine.low %v1094_v4, %v1101_v12  ;;  %v1110_v59 = vrot.slane %v1102_v11, %v2095_v19  ;;  %v1121_v20 = vcombine.low %v959_v8, %v963_v13 }
 0x124   : > { %1172 = vperm.xlu1 %1638, %v1069_v9   ;;  %v1122_v60 = vcombine.low %v967_v18, %v971_v48  ;;  %v1129_v14 = vrot.slane %v1119_v54, %v2095_v19  ;;  %v1782_v26 = vmov 0.0   ;;  %v1783_v29 = vmov -inf  }
 0x125   : > { %v1136_v21 = vrot.slane %v1120_v58, %v2095_v19  ;;  %v1117_v22 = vrot.slane %v1103_v61, %v2095_v19  ;;  %v1143_v15 = vrot.slane %v1121_v20, %v2095_v19  ;;  %251 = vst.msk [vmem:[#allocation2] sm:$0x1] %vm250_vm0, %v1782_v26  ;;  %1545 = vmatprep.subr.mxu1 %v1782_v26  ;;  %252 = vst.msk [vmem:[#allocation3] sm:$0x1] %vm250_vm0, %v1783_v29  ;;  %v1784_v37 = vmov 0.0|0.0  }
 0x126   : > { %v1150_v16 = vrot.slane %v1122_v60, %v2095_v19  ;;  %v1551_v34 = vpack.c.bf16 %v1223_v32, %v1222_v31  ;;  %1550 = vmatprep.subr.bf16.mxu0 %v1784_v37  ;;  %1542 = vmatprep.mubr.msk.f32.mxu0 %vm1785_vm1, %v1782_v26  ;;  %v1554_v38 = vpack.c.bf16 %v1225_v36, %v1224_v35  ;;  %v727_v39 = vand.u32 127, %v390_v7  ;;  %v1226_v60 = vld [vmem:[%s2311_s3] sm:$0xf] }
 0x127   : > { %v1151_v23 = vcombine.low %v1129_v14, %v1136_v21  ;;  %v1118_v17 = vcombine.low %v1110_v59, %v1117_v22  ;;  %1547 = vmatprep.mubr.msk.f32.mxu1 %vm1785_vm1, %v1782_v26  ;;  %1546 = vmatpush3.msk.msra.mxu1 %vm1324_vm7, %v1226_v60 }
 0x128   : > { %v1152_v24 = vcombine.low %v1143_v15, %v1150_v16  ;;  %1552 = vmatpush3.bf16.msra.mxu0 %v1551_v34  ;;  %v732_v40 = vadd.s32 4294967288, %v727_v39  ;;  %v739_v42 = vadd.s32 4294967280, %v727_v39  ;;  %v746_v0 = vadd.s32 4294967272, %v727_v39 }
 0x129   : > { %v1159_v25 = vrot.slane %v1151_v23, %v2095_v19  ;;  %1175 = vperm.xlu1 %1638, %v1118_v17   ;;  %1553 = vmatprep.subr.bf16.mxu0 %v1784_v37  ;;  %v730_v44 = vsub.s32 %v727_v39, %v2068_v10  ;;  %v1312_v15 = vstv %s1310_s22 }
 0x12a   : > { %v1166_v27 = vrot.slane %v1152_v24, %v2095_v19  ;;  %v735_v43 = vsub.s32 %v732_v40, %v2068_v10  ;;  %v742_v1 = vsub.s32 %v739_v42, %v2068_v10  ;;  %v749_v49 = vsub.s32 %v746_v0, %v2068_v10 }
 0x12c   : > { %v1167_v28 = vcombine.low %v1159_v25, %v1166_v27  ;;  %1555 = vmatpush3.bf16.msra.mxu0 %v1554_v38  ;;  %v317_v63 = vld [vmem:[#allocation2] sm:$0x1]  ;;  %v771_v18 = vld [vmem:[#allocation3] sm:$0x1] }
 0x12e   : > { %1178 = vperm.xlu1 %1638, %v1167_v28  }
 0x188   : > { %v716_v46 = vpop.permute.xlu0 %715 }
 0x189   : > { %v731_v51 = vrot.slane %v716_v46, %v730_v44 }
 0x18e   : > { %v719_v41 = vpop.permute.xlu1 %718 }
 0x18f   : > { %v736_v47 = vrot.slane %v719_v41, %v735_v43 }
 0x191   : > { %v738_v52 = vsel %vm737_vm2, %v736_v47, %v731_v51 }
 0x194   : > { %v722_v45 = vpop.permute.xlu1 %721 }
 0x195   : > { %v743_v50 = vrot.slane %v722_v45, %v742_v1 }
 0x197   : > { %v745_v55 = vsel %vm744_vm3, %v743_v50, %v738_v52 }
 0x199   : > { %v725_v7 = vpop.permute.xlu1 %724 }
 0x19a   : > { %v750_v53 = vrot.slane %v725_v7, %v749_v49 }
 0x19c   : > { %v752_v56 = vsel %vm751_vm4, %v750_v53, %v745_v55 }
 0x19d   : > { %v759_v57 = vrot.slane %v752_v56, %v2095_v19  ;;  %v1170_v62 = vpop.permute.xlu1 %1169 }
 0x19e   : > { %v1183_v5 = vrot.slane %v1170_v62, %v730_v44 }
 0x19f   : > { %v766_v30 = vrot.slane %v759_v57, %v2095_v19 }
 0x1a1   : > { %v768_v10 = vadd.f32 %v766_v30, %v317_v63 }
 0x1a3   : > { %v1173_v33 = vpop.permute.xlu1 %1172  ;;  %770 = vst.msk [vmem:[#allocation2] sm:$0x1] %vm250_vm0, %v768_v10 }
 0x1a4   : > { %v1187_v3 = vrot.slane %v1173_v33, %v735_v43 }
 0x1a6   : > { %v1188_v8 = vsel %vm737_vm2, %v1187_v3, %v1183_v5 }
 0x1a8   : > { %v1176_v2 = vpop.permute.xlu1 %1175 }
 0x1a9   : > { %v1192_v4 = vrot.slane %v1176_v2, %v742_v1 }
 0x1aa   : > { %v1219_v58 = vld [vmem:[#allocation2] sm:$0x1] }
 0x1ab   : > { %v1193_v12 = vsel %vm744_vm3, %v1192_v4, %v1188_v8  ;;  %v1220_v61 = vmul.f32 0.00048828125, %v1219_v58 }
 0x1ad   : > { %v1179_v6 = vpop.permute.xlu1 %1178 }
 0x1ae   : > { %v1197_v9 = vrot.slane %v1179_v6, %v749_v49 }
 0x1b0   : > { %v1198_v11 = vsel %vm751_vm4, %v1197_v9, %v1193_v12 }
 0x1b1   : > { %v1205_v13 = vrot.slane %v1198_v11, %v2095_v19 }
 0x1b3   : > { %v1212_v48 = vrot.slane %v1205_v13, %v2095_v19  ;;  %v1314_v19 = vstv %s1520_s13 }
 0x1b5   : > { %v1214_v54 = vmax.f32 %v771_v18, %v1212_v48 }
 0x1b7   : > { %1215 = vst.msk [vmem:[#allocation3] sm:$0x1] %vm250_vm0, %v1214_v54 }
 0x1be   : > { %v1518_v59 = vld [vmem:[#allocation3] ss:$0 sm:$0xff] }
 0x1bf   : > { %v1234_v20 = vsel %vm1233_vm5, %v1220_v61, %v1518_v59 }
 0x1c0   : > { %1543 = vmatmul.mubr.msk.f32.vlgmr.msra.gmra.mrb[0].mxu0 %vm1235_vm6, %v1234_v20 }
 0x293   : > { %v1305_v14 = vpop.f32.mrb[0].mxu0 }
 0x294   : > { %v1309_v21 = vmax.f32 %v1305_v14, 0.0  ;;  %v1544_v22 = vpop.f32.mrb[1].mxu0 }
 0x296   : > { %v1315_v16 = vmul.f32 %v1314_v19, %v1309_v21  ;;  %v1313_v23 = vmul.f32 %v1312_v15, %v1309_v21 }
 0x298   : > { %v1317_v17 = vrot.slane %v1315_v16, 1 }
 0x29a   : > { %v1319_v24 = vadd.f32 %v1317_v17, %v1313_v23 }
 0x29c   : > { %1548 = vmatmul.mubr.msk.f32.vlgmr.msra.gmra.mrb[0].mxu1 %vm1320_vm8, %v1319_v24 }
 0x36f   : > { %v1394_v25 = vpop.f32.mrb[0].mxu1 }
 0x370   : > { %v1398_v26 = vsub.f32 0.0, %v1394_v25  ;;  %v1549_v27 = vpop.f32.mrb[1].mxu1 }
 0x372   : > { %v1399_v28 = vmul.f32 1.442695, %v1398_v26 }
 0x374   : > { %1639 = vpow2.f32 %v1399_v28 }
 0x37e   : > { %v1640_v29 = vpop.eup %1639 }
 0x37f   : > { %v1401_v31 = vadd.f32 1.0, %v1640_v29 }
 0x381   : > { %1641 = vrcp.f32 %v1401_v31 }
 0x38b   : > { %v1642_v32 = vpop.eup %1641 }
 0x38c   : > { %1404 = vst.msk [vmem:[%s244_s29] sm:$0x1] %vm250_vm0, %v1642_v32 }
 0x38d   : > { %1701 = shalt.err (!%p1698_p8)
}
 0x38e   : > { %s1702_s14 = scalar_lea.hbm %s2258_s6, 16  ;;  %s1706_s21 = scalar_lea.hbm %s2312_s4, 32 }
 0x38f   : > { %p1703_p4 = scmp.ne.s32.totalorder %s2258_s6, %s1702_s14  ;;  %p1707_p5 = scmp.lt.u32.totalorder %s2258_s6, %s2312_s4 }
 0x390   : > { %p1708_p13 = scmp.lt.u32.totalorder %s1706_s21, %s1702_s14  ;;  %p1710_p7 = scmp.lt.u32.totalorder %s1702_s14, %s2258_s6 }
 0x391   : > { %p1704_p10 = pnand %p1703_p4, %p2328_p12 }
 0x392   : > { %p1709_p3 = por %p1708_p13, %p1707_p5 }
 0x393   : > { %p1705_p11 = pneg %p1704_p10 }
 0x394   : > { %p1711_p2 = por %p1710_p7, %p1709_p3 }
 0x396   : > { %p1712_p6 = pnand %p1711_p2, %p1705_p11 }
 0x398   : > { %1715 = shalt.err (!%p1712_p6)
}
 0x399   : > { %1562 = dma.vmem_to_hbm [thread:$0]  (%p2328_p12), %s2260_s23, 16, %s2258_s6, %s1406_s7  }
 0x39a PF: > { %s1430_s25 = sand.u32 1, %s1754_s15   ;;  %p2329_p0 = scmp.ne.s32.totalorder %s2321_s28, 0 }
 0x39b   : > { %p2330_p1 = scmp.ge.s32.totalorder %s1774_s20, 2  ;;  %s1431_s29 = scalar_lea.sflag [#allocation6], %s1430_s25 }
 0x39d   : > { %p1573_p9 = pnand %p2330_p1, %p2329_p0 }
 0x39f   : > { %1749 = dma.done.wait (!%p1573_p9), %s1431_s29, 16  }
 0x3a0   : > { %1751 = vsyncadd (!%p1573_p9), %s1431_s29, 4294967280  ;;  %s21_s20 = sadd.s32 1, %s1774_s20   ;;  %s2331_s15 = smov %s1758_s16 }
 0x3a1   : > { %p18_p8 = scmp.ge.s32.totalorder %s21_s20, 4   ;;  %s2332_s16 = smov %s1762_s17 }
 0x3a2   : > { %s2333_s17 = smov %s1922_s5  ;;  %s2334_s18 = smov %s1770_s19 }
 0x3a3   : > { %s2335_s19 = smov %s2337_s9  ;;  %20 = sbr.rel (!%p18_p8) target bundleno = 7 (0x7), region = 94 }
 0x3aa   :  { %1435 = vsyncpa [#allocation5], 1 }
 0x3ab   :  { %1437 = vsyncpa [#allocation5 + $0x1], 1 }
 0x3ac   :  { %1438 = vsyncpa [#allocation6], 1 }
 0x3ad   :  { %1440 = vsyncpa [#allocation6 + $0x1], 1 }
 0x3ae   :  { %1441 = vsyncpa [#allocation7], 1 }
 0x3af   :  { %1443 = vsyncpa [#allocation7 + $0x1], 1 }

</bundles_post_ra>
